<compile_context>
chip_gen: v7x
topology: tpu7x:2x2x1
jax: 0.10.0
libtpu: 0.0.40
codegen_flags: <defaults>
</compile_context>

<pallas_src>
import jax
import jax.numpy as jnp
from jax.experimental import pallas as pl
from jax.experimental.pallas import tpu as pltpu


BINS = (1, 2, 3, 4, 8, 16, 32, 64)
NUM_EMBEDDINGS = len(BINS) + 1  # 9


def distance_embedder_kernel(lengths_ref, table_ref, o_ref):
    # lengths_ref: [block_n, 1] int32, table_ref: [rows_pad, D] f32
    lengths = lengths_ref[...]

    # stoi: number of bins <= length  (index in [0, 8]). Scalar-constant
    # compares broadcast over the tile -> pure VPU work.
    idx = jnp.zeros(lengths.shape, dtype=jnp.int32)
    for b in BINS:
        idx = idx + (lengths >= b).astype(jnp.int32)          # [block_n, 1]

    # Embedding lookup as one-hot @ table on the MXU (exact: rows are 0/1).
    rows_pad = table_ref.shape[0]
    row_ids = jax.lax.broadcasted_iota(jnp.int32, (1, rows_pad), 1)
    one_hot = (idx == row_ids).astype(jnp.float32)             # [block_n, rows_pad]
    emb = jnp.dot(one_hot, table_ref[...],
                  preferred_element_type=jnp.float32)          # [block_n, D]

    # Dropout(0.2): identity in eval/inference mode.
    o_ref[...] = emb.astype(o_ref.dtype)


def distance_embedder_forward(lengths, table, *, block_n=512):
    """lengths: [N] int; table: [NUM_EMBEDDINGS, D] f32. Returns [N, D] f32."""
    N = int(lengths.shape[0])
    n_rows, D = table.shape

    # Pad the (tiny) table's row count to a multiple of 8 sublanes with zeros.
    rows_pad = pl.cdiv(n_rows, 8) * 8
    table_p = jnp.zeros((rows_pad, D), table.dtype).at[:n_rows, :].set(table)

    # Clamp the batch tile for small inputs and pad N to a multiple of it.
    block_n = max(8, min(block_n, pl.cdiv(N, 8) * 8))
    N_pad = pl.cdiv(N, block_n) * block_n
    lengths_p = jnp.zeros((N_pad, 1), jnp.int32).at[:N, 0].set(
        lengths.astype(jnp.int32))

    grid = (N_pad // block_n,)
    out = pl.pallas_call(
        distance_embedder_kernel,
        out_shape=jax.ShapeDtypeStruct((N_pad, D), table.dtype),
        grid_spec=pltpu.PrefetchScalarGridSpec(
            num_scalar_prefetch=0,
            grid=grid,
            in_specs=[
                pl.BlockSpec((block_n, 1), lambda i: (i, 0)),     # lengths tile
                pl.BlockSpec((rows_pad, D), lambda i: (0, 0)),    # table (resident)
            ],
            out_specs=pl.BlockSpec((block_n, D), lambda i: (i, 0)),
        ),
        compiler_params=pltpu.CompilerParams(
            dimension_semantics=("parallel",),   # shard batch tiles across TCs
        ),
    )(lengths_p, table_p)
    return out[:N]


def distance_embedder_ref(lengths, table):
    """Pure-JAX reference mirroring DistanceEmbedder.forward (eval mode)."""
    bins = jnp.array(BINS, dtype=jnp.int32)
    idx = jnp.sum((lengths[:, None].astype(jnp.int32) >= bins[None, :])
                  .astype(jnp.int32), axis=-1)
    return table[idx]


def init_table(key, distance_dim=20):
    """nn.Embedding default init: N(0, 1)."""
    return jax.random.normal(key, (NUM_EMBEDDINGS, distance_dim),
                             dtype=jnp.float32)


if __name__ == "__main__":
    key = jax.random.PRNGKey(0)
    k_len, k_emb = jax.random.split(key)

    N, D = 16, 20
    lengths = jax.random.randint(k_len, (N,), 0, 100, dtype=jnp.int32)
    table = init_table(k_emb, D)

    out = distance_embedder_forward(lengths, table, block_n=8)  # grid of 2 steps
    out = jax.block_until_ready(out)

    ref = distance_embedder_ref(lengths, table)
    assert out.shape == (N, D)
    assert jnp.allclose(out, ref, atol=1e-6, rtol=1e-6)

    print("KERNEL_OK")
</pallas_src>

<mosaic_0001>
module attributes {stable_mosaic.version = 11 : i64} {
  func.func @distance_embedder_kernel(%arg0: i32, %arg1: memref<8x1xi32, #tpu.memory_space<vmem>>, %arg2: memref<16x20xf32, #tpu.memory_space<vmem>>, %arg3: memref<8x20xf32, #tpu.memory_space<vmem>>) attributes {dimension_semantics = [#tpu.dimension_semantics<parallel>], iteration_bounds = array<i64: 2>, scalar_prefetch = 0 : i64, scratch_operands = 0 : i64, tpu.core_type = #tpu.core_type<tc>, window_params = [{transform_indices = @transform_0, window_bounds = array<i64: 8, 1>}, {pipeline_mode = #tpu.pipeline_mode<synchronous>, transform_indices = @transform_1, window_bounds = array<i64: 16, 20>}, {transform_indices = @transform_2, window_bounds = array<i64: 8, 20>}]} {
    %c0 = arith.constant 0 : index
    %c0_0 = arith.constant 0 : index
    %0 = vector.load %arg1[%c0, %c0_0] : memref<8x1xi32, #tpu.memory_space<vmem>>, vector<8x1xi32>
    %c0_i32 = arith.constant 0 : i32
    %1 = vector.broadcast %c0_i32 : i32 to vector<8x1xi32>
    %c1_i32 = arith.constant 1 : i32
    %2 = vector.broadcast %c1_i32 : i32 to vector<8x1xi32>
    %3 = arith.cmpi sge, %0, %2 : vector<8x1xi32>
    %4 = arith.extui %3 : vector<8x1xi1> to vector<8x1xi32>
    %5 = arith.addi %1, %4 : vector<8x1xi32>
    %c2_i32 = arith.constant 2 : i32
    %6 = vector.broadcast %c2_i32 : i32 to vector<8x1xi32>
    %7 = arith.cmpi sge, %0, %6 : vector<8x1xi32>
    %8 = arith.extui %7 : vector<8x1xi1> to vector<8x1xi32>
    %9 = arith.addi %5, %8 : vector<8x1xi32>
    %c3_i32 = arith.constant 3 : i32
    %10 = vector.broadcast %c3_i32 : i32 to vector<8x1xi32>
    %11 = arith.cmpi sge, %0, %10 : vector<8x1xi32>
    %12 = arith.extui %11 : vector<8x1xi1> to vector<8x1xi32>
    %13 = arith.addi %9, %12 : vector<8x1xi32>
    %c4_i32 = arith.constant 4 : i32
    %14 = vector.broadcast %c4_i32 : i32 to vector<8x1xi32>
    %15 = arith.cmpi sge, %0, %14 : vector<8x1xi32>
    %16 = arith.extui %15 : vector<8x1xi1> to vector<8x1xi32>
    %17 = arith.addi %13, %16 : vector<8x1xi32>
    %c8_i32 = arith.constant 8 : i32
    %18 = vector.broadcast %c8_i32 : i32 to vector<8x1xi32>
    %19 = arith.cmpi sge, %0, %18 : vector<8x1xi32>
    %20 = arith.extui %19 : vector<8x1xi1> to vector<8x1xi32>
    %21 = arith.addi %17, %20 : vector<8x1xi32>
    %c16_i32 = arith.constant 16 : i32
    %22 = vector.broadcast %c16_i32 : i32 to vector<8x1xi32>
    %23 = arith.cmpi sge, %0, %22 : vector<8x1xi32>
    %24 = arith.extui %23 : vector<8x1xi1> to vector<8x1xi32>
    %25 = arith.addi %21, %24 : vector<8x1xi32>
    %c32_i32 = arith.constant 32 : i32
    %26 = vector.broadcast %c32_i32 : i32 to vector<8x1xi32>
    %27 = arith.cmpi sge, %0, %26 : vector<8x1xi32>
    %28 = arith.extui %27 : vector<8x1xi1> to vector<8x1xi32>
    %29 = arith.addi %25, %28 : vector<8x1xi32>
    %c64_i32 = arith.constant 64 : i32
    %30 = vector.broadcast %c64_i32 : i32 to vector<8x1xi32>
    %31 = arith.cmpi sge, %0, %30 : vector<8x1xi32>
    %32 = arith.extui %31 : vector<8x1xi1> to vector<8x1xi32>
    %33 = arith.addi %29, %32 : vector<8x1xi32>
    %34 = tpu.iota {dimensions = array<i32: 1>} : vector<1x16xi32>
    %35 = vector.broadcast %33 : vector<8x1xi32> to vector<8x16xi32>
    %36 = vector.broadcast %34 : vector<1x16xi32> to vector<8x16xi32>
    %37 = arith.cmpi eq, %35, %36 : vector<8x16xi32>
    %38 = arith.extui %37 : vector<8x16xi1> to vector<8x16xi32>
    %39 = arith.sitofp %38 : vector<8x16xi32> to vector<8x16xf32>
    %c0_1 = arith.constant 0 : index
    %c0_2 = arith.constant 0 : index
    %40 = vector.load %arg2[%c0_1, %c0_2] : memref<16x20xf32, #tpu.memory_space<vmem>>, vector<16x20xf32>
    %cst = arith.constant dense<0.000000e+00> : vector<8x20xf32>
    %41 = tpu.matmul %39, %40, %cst {dimension_numbers = #tpu.dot_dimension_numbers<[1], [0], [0], [1], [0, 0, 1, 1], [], []>} : vector<8x16xf32>, vector<16x20xf32>, vector<8x20xf32> -> vector<8x20xf32>
    %c0_3 = arith.constant 0 : index
    %c0_4 = arith.constant 0 : index
    %42 = vector.load %arg3[%c0_3, %c0_4] : memref<8x20xf32, #tpu.memory_space<vmem>>, vector<8x20xf32>
    tpu.vector_store %arg3[%c0_3, %c0_4], %41 {strides = array<i32>} : memref<8x20xf32, #tpu.memory_space<vmem>>, vector<8x20xf32>,
    return
  }
  func.func @transform_0(%arg0: i32) -> (i32, i32) {
    %c0_i32 = arith.constant 0 : i32
    %c0_i32_0 = arith.constant 0 : i32
    return %arg0, %c0_i32 : i32, i32
  }
  func.func @transform_1(%arg0: i32) -> (i32, i32) {
    %c0_i32 = arith.constant 0 : i32
    %c0_i32_0 = arith.constant 0 : i32
    %c0_i32_1 = arith.constant 0 : i32
    return %c0_i32, %c0_i32_0 : i32, i32
  }
  func.func @transform_2(%arg0: i32) -> (i32, i32) {
    %c0_i32 = arith.constant 0 : i32
    %c0_i32_0 = arith.constant 0 : i32
    return %arg0, %c0_i32 : i32, i32
  }
}

</mosaic_0001>

<bundles_post_ra>
// kernel: tpu_custom_call.1
= control target key start
LH: loop header
LB: loop body
LE: loop exit
PB: predicated region body
PF: predicated region fallthrough
CT: control target
= control target key end

     0   :  { %7 = vsyncpa [#allocation3], 0  ;;  %s581_s0 = inlined_call_operand.vmem [shape: s32[16,1], index: 0, kind: input, shape index: {}]   ;;  %s582_s1 = inlined_call_operand.vmem [shape: f32[16,20], index: 1, kind: input, shape index: {}]   ;;  %s583_s2 = inlined_call_operand.hbm [shape: f32[16,20], index: 2, kind: output, shape index: {}]  }
   0x1   :  { %9 = vsyncpa [#allocation3 + $0x1], 0  ;;  %s475_s9 = smov 0   ;;  %s477_s10 = smov 0  }
   0x2   :  { %s479_s11 = smov 0   ;;  %s481_s12 = smov 0  }
   0x3 LB: > { %s496_s13 = sadd.s32 4294967295, %s453_s12   ;;  %s322_s14 = sadd.s32 4294967294, %s453_s12   ;;  %s453_s12 = sphi %s481_s12, %s589_s12   ;;  %s449_s11 = sphi %s479_s11, %s588_s11   ;;  %s445_s10 = sphi %s477_s10, %s587_s10   ;;  %s441_s9 = sphi %s475_s9, %s586_s9  }
   0x4   : > { %s500_s15 = sadd.s32 1, %s453_s12   ;;  %s69_s16 = sadd.s32 1, %s449_s11 }
   0x5   : > { %s66_s17 = ssub.s32 %s453_s12, %s500_s15  ;;  %p79_p0 = scmp.ne.s32.totalorder %s449_s11, %s445_s10 }
   0x6   : > { %p67_p1 = scmp.eq.s32.totalorder %s66_s17, 0  ;;  %p80_p2 = scmp.eq.s32.totalorder %s496_s13, 1 }
   0x7   : > { %p85_p3 = scmp.ne.s32.totalorder %s445_s10, %s441_s9  ;;  %p86_p4 = scmp.eq.s32.totalorder %s322_s14, 1 }
   0x8   : > { %s511_s18 = scalar_select %p67_p1, %s449_s11, %s69_s16  }
   0x9   : > { %p513_p5 = por %p80_p2, %p79_p0  ;;  %p517_p6 = por %p86_p4, %p85_p3 }
   0xa   : > { %p325_p7 = scmp.ge.s32.totalorder %s453_s12, 1  ;;  %p114_p8 = scmp.lt.s32.totalorder %s453_s12, 3 }
   0xc   : > { %p115_p9 = pnand %p325_p7, %p114_p8 }
   0xd   : > { %p135_p10 = scmp.lt.s32.totalorder (!%p115_p9), %s496_s13, 1  ;;  %v171_v0 = vld [vmem:[%s582_s1] sm:$0xff] (!%p115_p9)  ;;  %v172_v1 = vld [vmem:[%s582_s1 + $0x8] sm:$0xff] (!%p115_p9)  ;;  %v455_v2 = vmov (!%p115_p9), 0   ;;  %v456_v3 = vmov (!%p115_p9), 0.0|0.0   ;;  %vm457_vm8 = vmmov (!%p115_p9), 0   ;;  %v163_v22 = vlaneseq (!%p115_p9) }
   0xe   : > { %118 = sbr.rel (%p115_p9) target bundleno = 398 (0x18e), region = 28  ;;  %390 = vset.pattern.permute.xlu0 (!%p115_p9), %v455_v2  ;;  %344 = vmatprep.subr.bf16.mxu0 (!%p115_p9), %v456_v3  ;;  %v345_v4 = vpack.c.bf16 (!%p115_p9), %v172_v1, %v171_v0  ;;  %v458_v21 = vmov (!%p115_p9), 0.0   ;;  %vm173_vm9 = vcmask (!%p115_p9), 130048   ;;  %s132_s30 = sand.u32 (!%p115_p9), 1, %s445_s10   ;;  %vm247_vm11 = vcmask (!%p115_p9), 162816  }
   0xf   : > { %341 = vmatprep.mubr.msk.f32.mxu0 (!%p115_p9), %vm457_vm8, %v458_v21  ;;  %v164_v23 = vand.u32 (!%p115_p9), 127, %v163_v22  ;;  %s326_s3 = sshll.u32 (!%p115_p9), %s132_s30, 3  ;;  %s331_s4 = sshll.u32 (!%p115_p9), %s496_s13, 7 }
  0x10   : > { %346 = vmatpush3.bf16.msra.mxu0 (!%p115_p9), %v345_v4  ;;  %s134_s5 = scalar_lea.vmem (!%p115_p9), [#allocation2], %s326_s3  ;;  %s539_s14 = scalar_lea.hbm (!%p115_p9), %s583_s2, %s331_s4 }
  0x11   : > { %s263_s6 = sshll.u32 (!%p115_p9), %s134_s5, 4  ;;  %s250_s16 = scalar_lea.sflag (!%p115_p9), [#allocation3], %s132_s30  ;;  %s541_s6 = int_to_ptr.vmem [resolvable:$true] %s263_s6 }
  0x12   : > { %s391_s17 = scalar_lea.vmem (!%p115_p9), %s541_s6, 128 }
  0x13   : > { %p392_p11 = scmp.ne.s32.totalorder (!%p115_p9), %s541_s6, %s391_s17 }
  0x15   : > { %s136_s25 = scalar_select %p135_p10, %s496_s13, 1 }
  0x16   : > { %p393_p12 = pnand %p392_p11, %p513_p5  ;;  %s459_s13 = smov [#allocation2]  }
  0x17   : > { %s327_s26 = sshll.u32 %s136_s25, 3  ;;  %s395_s21 = sshll.u32 %s459_s13, 4  ;;  %s396_s21 = int_to_ptr.vmem [resolvable:$false] %s395_s21 }
  0x18   : > { %s138_s29 = scalar_lea.vmem %s581_s0, %s327_s26  ;;  %p394_p13 = pneg %p393_p12 }
  0x19   : > { %v139_v5 = vld [vmem:[%s138_s29] sm:$0xff]  ;;  %s397_s22 = scalar_lea.vmem %s396_s21, 256  ;;  %p398_p0 = scmp.lt.s32.totalorder %s541_s6, %s396_s21 }
  0x1a   : > { %vm140_vm0 = vcmp.ge.s32.totalorder %v139_v5, 1  ;;  %vm142_vm1 = vcmp.ge.s32.totalorder %v139_v5, 2  ;;  %vm145_vm2 = vcmp.ge.s32.totalorder %v139_v5, 3  ;;  %vm148_vm3 = vcmp.ge.s32.totalorder %v139_v5, 4  ;;  %p399_p1 = scmp.lt.s32.totalorder %s397_s22, %s391_s17 }
  0x1b   : > { %v141_v6 = vsel %vm140_vm0, 1, %v455_v2  ;;  %v143_v7 = vsel %vm142_vm1, 1, %v455_v2  ;;  %v146_v8 = vsel %vm145_vm2, 1, %v455_v2  ;;  %vm151_vm4 = vcmp.ge.s32.totalorder %v139_v5, 8 }
  0x1c   : > { %v144_v9 = vadd.s32 %v143_v7, %v141_v6  ;;  %v149_v10 = vsel %vm148_vm3, 1, %v455_v2  ;;  %vm154_vm5 = vcmp.ge.s32.totalorder %v139_v5, 16  ;;  %v152_v12 = vsel %vm151_vm4, 1, %v455_v2  ;;  %p400_p2 = por %p399_p1, %p398_p0 }
  0x1d   : > { %vm157_vm6 = vcmp.ge.s32.totalorder %v139_v5, 32  ;;  %v155_v14 = vsel %vm154_vm5, 1, %v455_v2  ;;  %vm160_vm7 = vcmp.ge.s32.totalorder %v139_v5, 64 }
  0x1e   : > { %v147_v11 = vadd.s32 %v146_v8, %v144_v9  ;;  %v158_v16 = vsel %vm157_vm6, 1, %v455_v2  ;;  %v161_v18 = vsel %vm160_vm7, 1, %v455_v2  ;;  %p401_p3 = pnand %p400_p2, %p394_p13 }
  0x20   : > { %v150_v13 = vadd.s32 %v149_v10, %v147_v11 }
  0x22   : > { %v153_v15 = vadd.s32 %v152_v12, %v150_v13 }
  0x24   : > { %v156_v17 = vadd.s32 %v155_v14, %v153_v15 }
  0x26   : > { %v159_v19 = vadd.s32 %v158_v16, %v156_v17 }
  0x28   : > { %v162_v20 = vadd.s32 %v161_v18, %v159_v19 }
  0x2a   : > { %166 = vperm.xlu0 %390, %v162_v20  }
  0xa9   : > { %v167_v24 = vpop.permute.xlu0 %166 }
  0xaa   : > { %vm168_vm10 = vcmp.eq.s32.totalorder %v167_v24, %v164_v23 }
  0xab   : > { %v328_v25 = vsel %vm168_vm10, 1.0, %v458_v21 }
  0xac   : > { %342 = vmatmul.mubr.msk.f32.vlgmr.msra.gmra.mrb[0].mxu0 %vm173_vm9, %v328_v25 }
 0x17f   : > { %v243_v26 = vpop.f32.mrb[0].mxu0 }
 0x180   : > { %248 = vst.msk [vmem:[%s134_s5] sm:$0xff] %vm247_vm11, %v243_v26  ;;  %v343_v27 = vpop.f32.mrb[1].mxu0 }
 0x181   : > { %404 = shalt.err (!%p401_p3)
}
 0x182   : > { %s405_s23 = scalar_lea.hbm %s539_s14, 128  ;;  %s409_s26 = scalar_lea.hbm %s583_s2, 256 }
 0x183   : > { %p406_p4 = scmp.ne.s32.totalorder %s539_s14, %s405_s23  ;;  %p410_p9 = scmp.lt.u32.totalorder %s539_s14, %s583_s2 }
 0x184   : > { %p411_p10 = scmp.lt.u32.totalorder %s409_s26, %s405_s23  ;;  %p413_p12 = scmp.lt.u32.totalorder %s405_s23, %s539_s14 }
 0x185   : > { %p407_p7 = pnand %p406_p4, %p513_p5 }
 0x186   : > { %p412_p11 = por %p411_p10, %p410_p9 }
 0x187   : > { %p408_p8 = pneg %p407_p7 }
 0x188   : > { %p414_p13 = por %p413_p12, %p412_p11 }
 0x18a   : > { %p415_p0 = pnand %p414_p13, %p408_p8 }
 0x18c   : > { %418 = shalt.err (!%p415_p0)
}
 0x18d   : > { %347 = dma.vmem_to_hbm [thread:$0]  (%p513_p5), %s541_s6, 128, %s539_s14, %s250_s16  }
 0x18e PF: > { %p353_p1 = scmp.ge.s32.totalorder %s453_s12, 2  ;;  %s275_s29 = sand.u32 1, %s441_s9  }
 0x18f   : > { %s276_s30 = scalar_lea.sflag [#allocation3], %s275_s29 }
 0x190   : > { %p350_p2 = pnand %p353_p1, %p517_p6 }
 0x192   : > { %436 = dma.done.wait (!%p350_p2), %s276_s30, 128  }
 0x193   : > { %438 = vsyncadd (!%p350_p2), %s276_s30, 4294967168  ;;  %p12_p3 = scmp.ge.s32.totalorder %s500_s15, 4   ;;  %s586_s9 = smov %s445_s10 }
 0x194   : > { %s587_s10 = smov %s449_s11  ;;  %s588_s11 = smov %s511_s18 }
 0x195   : > { %s589_s12 = smov %s500_s15  ;;  %14 = sbr.rel (!%p12_p3) target bundleno = 3 (0x3), region = 63 }
 0x19c   :  { %281 = vsyncpa [#allocation3], 1 }
 0x19d   :  { %283 = vsyncpa [#allocation3 + $0x1], 1 }

</bundles_post_ra>
